<compile_context>
chip_gen: v5e
topology: v5e:2x2
jax: 0.10.0
libtpu: 0.0.40
codegen_flags: <defaults>
</compile_context>

<pallas_src>
import functools
import math

import jax
import jax.numpy as jnp
from jax.experimental import pallas as pl
from jax.experimental.pallas import tpu as pltpu

_LANE = 128
_SUBLANE = 8


def _round_up(v, m):
    return ((v + m - 1) // m) * m


@functools.lru_cache(maxsize=1)
def _chip_config():
    """(target_tile_bytes, vmem_limit_bytes, min_grid_steps) per TPU generation."""
    kind = ""
    try:
        kind = jax.devices()[0].device_kind.lower().replace(" ", "")
    except Exception:
        pass
    if "v5lite" in kind or "v5e" in kind:
        cfg = (4 << 20, 48 << 20, 1)    # v5e: 1 TC, ~0.82 TB/s -> 4 MiB already amortizes
    elif "v6" in kind:
        cfg = (16 << 20, 96 << 20, 1)   # v6e: 1 TC, 128 MiB VMEM -> big tiles are free
    elif "7" in kind:
        cfg = (8 << 20, 48 << 20, 4)    # v7x: 2 TC, 64 MiB VMEM, ~3.2 TB/s per TC
    elif "v4" in kind or "v5p" in kind or "v5" in kind:
        cfg = (8 << 20, 64 << 20, 4)    # megacore generations: 2 TCs per device
    else:
        cfg = (4 << 20, 48 << 20, 1)    # unknown: conservative, works everywhere
    tile_bytes, vmem_limit, min_steps = cfg
    # Clamp against physical VMEM if queryable (keeps the config safe even if
    # the device_kind heuristic mis-detects the generation).
    try:
        phys = pltpu.get_tpu_info().vmem_capacity_bytes
        vmem_limit = min(vmem_limit, (phys * 3) // 4)
    except Exception:
        pass
    # 2 arrays x 2 pipeline buffers per tile + headroom must fit the limit.
    tile_bytes = min(tile_bytes, vmem_limit // 6)
    return tile_bytes, vmem_limit, min_steps


def _quant_kernel(params_ref, x_ref, o_ref, *, dequantize):
    # params_ref (SMEM, f32[3]): [0] = effective clip_val, [1] = scale, [2] = 1/scale
    clip_val = params_ref[0]
    scale = params_ref[1]
    inv_scale = params_ref[2]
    # Compute in f32 regardless of input dtype: HBM traffic unchanged, VALU has
    # >3x slack, and it fixes floor() bin errors for bf16/fp16 inputs.
    x = x_ref[...].astype(jnp.float32)
    y = jnp.clip(x, 0.0, clip_val)      # clamp(x, 0, clip_val)
    y = jnp.floor(scale * y)            # linear_quantize
    if dequantize:
        y = y * inv_scale               # linear_dequantize (scalar mul, not per-elem div)
    o_ref[...] = y.astype(o_ref.dtype)


def _scale_params(clip_val, num_bits, round_pow2):
    n_levels = float(2 ** num_bits - 1)
    scale = n_levels / clip_val[0]
    if round_pow2:
        scale = jnp.exp2(jnp.floor(jnp.log2(scale)))
        clip_eff = n_levels / scale
    else:
        clip_eff = clip_val[0]
    inv_scale = 1.0 / scale
    return clip_eff, scale, inv_scale


def _quant_jnp(x, clip_eff, scale, inv_scale, dequantize, out_dtype):
    """Plain-jnp fallback for the tiny (<128 element) irregular tail."""
    y = jnp.clip(x.astype(jnp.float32), 0.0, clip_eff)
    y = jnp.floor(scale * y)
    if dequantize:
        y = y * inv_scale
    return y.astype(out_dtype)


def learned_clipped_linear_quantization(
    x, clip_val, *, num_bits, dequantize=True, round_pow2=False,
    out_dtype=None, target_tile_bytes=None,
):
    """Pallas implementation of LearnedClippedLinearQuantization.forward.

    x        : float array, any shape (NCHW for conv activations).
    clip_val : float32 array of shape (1,) (the learned clip parameter).
    out_dtype: optional output dtype override (e.g. jnp.int8 when
               dequantize=False) -- opt-in deviation from the float-return
               PyTorch semantics that quarters output HBM traffic.
    """
    out_dtype = jnp.dtype(x.dtype if out_dtype is None else out_dtype)
    clip_eff, scale, inv_scale = _scale_params(clip_val, num_bits, round_pow2)
    params = jnp.stack([clip_eff, scale, inv_scale]).astype(jnp.float32)  # -> SMEM

    orig_shape = x.shape
    total = math.prod(orig_shape) if orig_shape else 1
    if total == 0:
        return x.astype(out_dtype)

    tile_bytes, vmem_limit, min_steps = _chip_config()
    if target_tile_bytes is not None:
        tile_bytes = int(target_tile_bytes)

    x_flat = x.reshape(-1)
    main_total = (total // _LANE) * _LANE   # lane-aligned prefix (no pad / no slice
                                            # copy in the common total % 128 == 0 case)

    pieces = []
    if main_total > 0:
        rows = main_total // _LANE
        x2d = (x_flat if main_total == total else x_flat[:main_total]).reshape(rows, _LANE)

        in_size = jnp.dtype(x.dtype).itemsize
        out_size = out_dtype.itemsize
        # Sublane packing minimum: 8 rows (32-bit), 16 (bf16), 32 (int8); keyed on
        # the narrower of input/output dtype so both block layouts stay native.
        sub = _SUBLANE * max(1, 4 // min(in_size, out_size))
        # Byte-constant tiles: identical per-step-overhead amortization for any dtype.
        target_rows = max(1, tile_bytes // (_LANE * max(in_size, out_size)))

        if rows < sub:
            br = rows                       # full-array block (block == array dim is legal)
        else:
            br = _round_up(target_rows, sub)
            if min_steps > 1:
                # Dual-TC chips: keep >= min_steps grid steps (>= 2 per TensorCore)
                # so each core still overlaps DMA / compute / writeback after sharding.
                br = min(br, max(sub, _round_up(pl.cdiv(rows, min_steps), sub)))
            # Never exceed the array; last block may be partial (masked).
            br = min(br, (rows // sub) * sub)
        grid = (pl.cdiv(rows, br),)

        out2d = pl.pallas_call(
            functools.partial(_quant_kernel, dequantize=dequantize),
            out_shape=jax.ShapeDtypeStruct((rows, _LANE), out_dtype),
            grid=grid,
            in_specs=[
                pl.BlockSpec(memory_space=pltpu.SMEM),        # scalar params
                pl.BlockSpec((br, _LANE), lambda i: (i, 0)),  # activation tile
            ],
            out_specs=pl.BlockSpec((br, _LANE), lambda i: (i, 0)),
            compiler_params=pltpu.CompilerParams(
                dimension_semantics=("parallel",),
                vmem_limit_bytes=vmem_limit,
            ),
        )(params, x2d)
        pieces.append(out2d.reshape(-1))

    if main_total != total:
        # TODO(synk): tiny (<128 elem) irregular tail handled in plain jnp; for
        # non-128-aligned totals the slice + concatenate cost ~2 extra HBM passes.
        # Fuse a masked ragged tail into the kernel if that case ever matters
        # (conv activations are 128-aligned in practice).
        pieces.append(_quant_jnp(x_flat[main_total:], clip_eff, scale,
                                 inv_scale, dequantize, out_dtype))

    out_flat = pieces[0] if len(pieces) == 1 else jnp.concatenate(pieces)
    return out_flat.reshape(orig_shape)


def _reference(x, clip_val, *, num_bits, dequantize=True, round_pow2=False):
    n_levels = float(2 ** num_bits - 1)
    scale = n_levels / clip_val[0]
    if round_pow2:
        scale = jnp.exp2(jnp.floor(jnp.log2(scale)))
        clip_eff = n_levels / scale
    else:
        clip_eff = clip_val[0]
    y = jnp.clip(x.astype(jnp.float32), 0.0, clip_eff)
    y = jnp.floor(scale * y)
    if dequantize:
        y = y / scale
    return y


if __name__ == "__main__":
    key = jax.random.PRNGKey(0)
    k0, k1, k2, k3 = jax.random.split(key, 4)

    clip_val = jnp.array([6.0], dtype=jnp.float32)   # init_act_clip_val = 6
    num_bits = 4

    # NCHW activations, small shape (batch=2, channels=4, 16x16 spatial).
    x = jax.random.normal(k0, (2, 4, 16, 16), dtype=jnp.float32) * 4.0
    for round_pow2 in (False, True):
        out = jax.block_until_ready(learned_clipped_linear_quantization(
            x, clip_val, num_bits=num_bits, dequantize=True, round_pow2=round_pow2))
        ref = _reference(x, clip_val, num_bits=num_bits, dequantize=True,
                         round_pow2=round_pow2)
        assert out.shape == x.shape and out.dtype == x.dtype
        assert jnp.allclose(out, ref, atol=1e-6, rtol=1e-6), "f32 mismatch vs reference"

    # bf16 input: kernel upcasts to f32 internally so floor() bins match the f32
    # reference (differences limited to bf16 output rounding).
    x_bf = (jax.random.normal(k1, (2, 8, 16, 16), dtype=jnp.float32) * 4.0
            ).astype(jnp.bfloat16)
    out_bf = jax.block_until_ready(
        learned_clipped_linear_quantization(x_bf, clip_val, num_bits=num_bits))
    ref_bf = _reference(x_bf, clip_val, num_bits=num_bits)
    assert out_bf.dtype == jnp.bfloat16 and out_bf.shape == x_bf.shape
    assert jnp.allclose(out_bf.astype(jnp.float32), ref_bf, atol=5e-2, rtol=2e-2), \
        "bf16 mismatch vs f32 reference"

    # Irregular element count (not a multiple of 128): masked partial last block
    # plus the tiny jnp tail path.
    x_odd = jax.random.normal(k2, (3, 5, 7, 11), dtype=jnp.float32) * 4.0
    out_odd = jax.block_until_ready(
        learned_clipped_linear_quantization(x_odd, clip_val, num_bits=num_bits))
    ref_odd = _reference(x_odd, clip_val, num_bits=num_bits)
    assert out_odd.shape == x_odd.shape
    assert jnp.allclose(out_odd, ref_odd, atol=1e-6, rtol=1e-6), "odd-shape mismatch"

    # Opt-in integer output for dequantize=False (4x less output HBM traffic).
    x_q = jax.random.normal(k3, (2, 8, 32, 32), dtype=jnp.float32) * 4.0
    out_i8 = jax.block_until_ready(learned_clipped_linear_quantization(
        x_q, clip_val, num_bits=num_bits, dequantize=False, out_dtype=jnp.int8))
    ref_i8 = _reference(x_q, clip_val, num_bits=num_bits,
                        dequantize=False).astype(jnp.int8)
    assert out_i8.dtype == jnp.int8 and out_i8.shape == x_q.shape
    assert jnp.array_equal(out_i8, ref_i8), "int8 quantized output mismatch"

    print("KERNEL_OK")
</pallas_src>

<mosaic_0001>
module attributes {stable_mosaic.version = 11 : i64} {
  func.func @_quant_kernel(%arg0: i32, %arg1: memref<3xf32, #tpu.memory_space<smem>>, %arg2: memref<16x128xf32, #tpu.memory_space<vmem>>, %arg3: memref<16x128xf32, #tpu.memory_space<vmem>>) attributes {dimension_semantics = [#tpu.dimension_semantics<parallel>], iteration_bounds = array<i64: 1>, scalar_prefetch = 0 : i64, scratch_operands = 0 : i64, tpu.core_type = #tpu.core_type<tc>, window_params = [{transform_indices = @transform_0, window_bounds = array<i64: 3>}, {transform_indices = @transform_1, window_bounds = array<i64: 16, 128>}, {transform_indices = @transform_2, window_bounds = array<i64: 16, 128>}]} {
    %c0 = arith.constant 0 : index
    %0 = memref.load %arg1[%c0] : memref<3xf32, #tpu.memory_space<smem>>
    %c1 = arith.constant 1 : index
    %1 = memref.load %arg1[%c1] : memref<3xf32, #tpu.memory_space<smem>>
    %c2 = arith.constant 2 : index
    %2 = memref.load %arg1[%c2] : memref<3xf32, #tpu.memory_space<smem>>
    %c0_0 = arith.constant 0 : index
    %c0_1 = arith.constant 0 : index
    %3 = vector.load %arg2[%c0_0, %c0_1] : memref<16x128xf32, #tpu.memory_space<vmem>>, vector<16x128xf32>
    %cst = arith.constant 0.000000e+00 : f32
    %4 = vector.broadcast %cst : f32 to vector<16x128xf32>
    %5 = arith.maximumf %4, %3 : vector<16x128xf32>
    %6 = vector.broadcast %0 : f32 to vector<16x128xf32>
    %7 = arith.minimumf %6, %5 : vector<16x128xf32>
    %8 = vector.broadcast %1 : f32 to vector<16x128xf32>
    %9 = arith.mulf %8, %7 : vector<16x128xf32>
    %10 = math.floor %9 : vector<16x128xf32>
    %11 = vector.broadcast %2 : f32 to vector<16x128xf32>
    %12 = arith.mulf %10, %11 : vector<16x128xf32>
    %c0_2 = arith.constant 0 : index
    %c0_3 = arith.constant 0 : index
    %13 = vector.load %arg3[%c0_2, %c0_3] : memref<16x128xf32, #tpu.memory_space<vmem>>, vector<16x128xf32>
    tpu.vector_store %arg3[%c0_2, %c0_3], %12 {strides = array<i32>} : memref<16x128xf32, #tpu.memory_space<vmem>>, vector<16x128xf32>,
    return
  }
  func.func @transform_0(%arg0: i32) -> i32 {
    %c0_i32 = arith.constant 0 : i32
    %c0_i32_0 = arith.constant 0 : i32
    return %c0_i32 : i32
  }
  func.func @transform_1(%arg0: i32) -> (i32, i32) {
    %c0_i32 = arith.constant 0 : i32
    %c0_i32_0 = arith.constant 0 : i32
    return %arg0, %c0_i32 : i32, i32
  }
  func.func @transform_2(%arg0: i32) -> (i32, i32) {
    %c0_i32 = arith.constant 0 : i32
    %c0_i32_0 = arith.constant 0 : i32
    return %arg0, %c0_i32 : i32, i32
  }
}

</mosaic_0001>

<bundles_post_ra>
// kernel: tpu_custom_call.1
= control target key start
LH: loop header
LB: loop body
LE: loop exit
PB: predicated region body
PF: predicated region fallthrough
CT: control target
= control target key end

     0   :  { %7 = vsyncpa [#allocation5], 0  ;;  %s189_s0 = inlined_call_operand.hbm [shape: f32[3], index: 0, kind: input, shape index: {}]   ;;  %s190_s1 = inlined_call_operand.hbm [shape: f32[16,128], index: 1, kind: input, shape index: {}]   ;;  %s191_s2 = inlined_call_operand.hbm [shape: f32[16,128], index: 2, kind: output, shape index: {}]  }
   0x1   :  { %8 = vsyncpa [#allocation3], 0 }
   0x2   :  { %9 = vsyncpa [#allocation4], 0  ;;  %s15_s11 = sshll.u32 %s189_s0, 4  ;;  %s23_s14 = sshll.u32 %s190_s1, 4  ;;  %s16_s11 = int_to_ptr.hbm [resolvable:$true] %s15_s11  ;;  %s24_s14 = int_to_ptr.hbm [resolvable:$true] %s23_s14 }
   0x3   :  { %s154_s15 = smov [#allocation2]   ;;  %s155_s16 = smov [#allocation6]  }
   0x4   :  { %18 = dma.hbm_to_smem %s16_s11, 16, %s154_s15, [#allocation5]  }
   0x5   :  { %s25_s17 = sshll.u32 %s155_s16, 4  ;;  %s156_s18 = smov 128   ;;  %s26_s17 = int_to_ptr.vmem [resolvable:$true] %s25_s17 }
   0x6   :  { %s157_s19 = smov 8  }
   0x7   :  { %31 = dma.hbm_to_vmem [thread:$0]  %s24_s14, 256, %s26_s17, [#allocation3], %s156_s18, %s156_s18, %s157_s19  }
   0x8   :  { %148 = dma.done.wait [#allocation5], 16  }
   0x9   :  { %149 = vsyncadd [#allocation5], 4294967280 }
   0xa   :  { %150 = dma.done.wait [#allocation3], 256  }
   0xb   :  { %151 = vsyncadd [#allocation3], 4294967040 }
   0xc   :  { %40 = sfence }
   0xd   :  { %s41_s0 = sld [smem:[#allocation2]]  ;;  %v44_v0 = vld [vmem:[#allocation6] sm:$0xff]  ;;  %v45_v1 = vld [vmem:[#allocation6 + $0x8] sm:$0xff]  ;;  %s158_s21 = smov [#allocation7]  }
   0xe   :  { %s81_s1 = sld [smem:[#allocation2 + $0x1]]  ;;  %v46_v2 = vmax.f32 %v44_v0, 0.0  ;;  %v47_v3 = vmax.f32 %v45_v1, 0.0  ;;  %s65_s22 = sshll.u32 %s158_s21, 4  ;;  %s66_s22 = int_to_ptr.vmem [resolvable:$true] %s65_s22 }
   0xf   :  { %s82_s20 = sld [smem:[#allocation2 + $0x2]]  ;;  %s67_s25 = sshll.u32 %s191_s2, 4  ;;  %s68_s25 = int_to_ptr.hbm [resolvable:$true] %s67_s25 }
  0x13   :  { %v48_v4 = vstv %s41_s0 }
  0x14   :  { %v49_v5 = vmin.f32 %v48_v4, %v46_v2  ;;  %v51_v6 = vstv %s81_s1  ;;  %v50_v7 = vmin.f32 %v48_v4, %v47_v3 }
  0x15   :  { %v56_v10 = vstv %s82_s20 }
  0x16   :  { %v52_v8 = vmul.f32 %v51_v6, %v49_v5  ;;  %v53_v9 = vmul.f32 %v51_v6, %v50_v7 }
  0x18   :  { %v54_v11 = vfloor.f32 %v52_v8  ;;  %v55_v12 = vfloor.f32 %v53_v9 }
  0x1a   :  { %v57_v13 = vmul.f32 %v56_v10, %v54_v11  ;;  %v58_v14 = vmul.f32 %v56_v10, %v55_v12 }
  0x1c   :  { %59 = vst [vmem:[#allocation7] sm:$0xff] %v57_v13 }
  0x1d   :  { %60 = vst [vmem:[#allocation7 + $0x8] sm:$0xff] %v58_v14 }
  0x1e   :  { %73 = dma.vmem_to_hbm [thread:$0]  %s66_s22, 256, %s68_s25, [#allocation4], %s156_s18, %s156_s18, %s157_s19  }
  0x1f   :  { %152 = dma.done.wait [#allocation4], 256  }
  0x20   :  { %153 = vsyncadd [#allocation4], 4294967040 }
  0x21   :  { %78 = vsyncpa [#allocation3], 1 }
  0x22   :  { %79 = vsyncpa [#allocation4], 1 }
  0x23   :  { %80 = vsyncpa [#allocation5], 1 }

</bundles_post_ra>
